<compile_context>
chip_gen: v7x
topology: tpu7x:2x2x1
jax: 0.10.0
libtpu: 0.0.40
codegen_flags: <defaults>
</compile_context>

<pallas_src>
import functools

import numpy as np

import jax
import jax.numpy as jnp
from jax.experimental import pallas as pl
from jax.experimental.pallas import tpu as pltpu


def _round_up(x, m):
    return ((x + m - 1) // m) * m


def _conv_silu_kernel(x_ref, m_ref, w_ref, o_ref, *, k, p, Wimg, N, D0):
    """Fused 3x3 conv (+bias) + SiLU for a whole small batch in one grid step.

    x_ref: (N, C1, L_buf)  flattened images with D0 left / margin right zero lanes
    m_ref: (F,  N*L)       0/1 zero-padding masks, F = k*k*C1 + 1 (last row ones)
    w_ref: (C2, F)         fused weights; last column is the bias
    o_ref: (N, C2, L)      SiLU(conv) on the unpadded H*W grid, L = H*W
    """
    L = o_ref.shape[-1]
    NL = N * L

    # Build the im2col matrix in VMEM: one lane-shifted copy of the image per tap.
    imgs = []
    for n in range(N):                                    # tiny static unroll
        xv = x_ref[n]                                     # (C1, L_buf)
        rows = []
        for kh in range(k):
            for kw in range(k):
                d = (kh - p) * Wimg + (kw - p)            # flat tap offset (may be < 0)
                a = D0 + d                                # margin makes every start >= 0
                rows.append(xv[:, a:a + L])               # static lane slice (C1, L)
        imgs.append(jnp.concatenate(rows, axis=0))        # (k*k*C1, L)
    xcat = jnp.concatenate(imgs, axis=1)                  # (k*k*C1, N*L) aligned lane concat
    xcat = jnp.concatenate(
        [xcat, jnp.ones((1, NL), jnp.float32)], axis=0)   # bias row -> (F, N*L)
    xcat = xcat * m_ref[...]                              # emulate ZERO padding

    # Single MXU pass: taps + channels + bias all in one contraction.
    acc = jnp.dot(w_ref[...], xcat,
                  preferred_element_type=jnp.float32)     # (C2, N*L)
    y = acc * jax.nn.sigmoid(acc)                         # SiLU epilogue (f32)

    for n in range(N):                                    # aligned 256-lane slices
        o_ref[n] = y[:, n * L:(n + 1) * L].astype(o_ref.dtype)


def conv_forward(x, weight, bias, *, k=3, p=1, s=1, d=1):
    """SiLU(Conv2d(x, weight, bias, stride=s, padding=p, dilation=d)), NCHW.

    x: (N, C1, H, W) f32, weight: (C2, C1, k, k) f32, bias: (C2,) f32.
    """
    N, C1, H, W = x.shape
    C2 = weight.shape[0]
    assert s == 1 and d == 1 and 2 * p == k - 1, (
        "implemented for the module config: stride=1, dilation=1, 'same' size")
    # TODO(synk): stride>1 / dilation>1 / depthwise paths would need strided lane
    # gathers and a different output tiling; not exercised by this Conv config.

    L = H * W                                    # flattened unpadded grid (lane axis)
    F = k * k * C1 + 1                           # fused contraction depth (+1 = bias)
    D0 = p * W + p                               # largest negative tap offset magnitude
    d_pos = (k - 1 - p) * W + (k - 1 - p)        # largest positive tap offset
    L_buf = _round_up(D0 + L + d_pos, 128)       # margin-padded lane width per image

    # ---- compile-time constants (numpy): padding masks + fused weight layout ----
    rr = np.arange(L) // W
    cc = np.arange(L) % W
    tap_masks = []
    for kh in range(k):
        for kw in range(k):
            r2, c2 = rr + kh - p, cc + kw - p
            m = ((r2 >= 0) & (r2 < H) & (c2 >= 0) & (c2 < W)).astype(np.float32)
            tap_masks.append(np.repeat(m[None, :], C1, axis=0))   # (C1, L)
    tap_masks.append(np.ones((1, L), np.float32))                  # bias row stays 1
    mask = jnp.asarray(np.tile(np.concatenate(tap_masks, axis=0), (1, N)))  # (F, N*L)

    # W_cat[o, (kh*k+kw)*C1 + c] = weight[o, c, kh, kw]; last column = bias.
    w_cat = jnp.concatenate(
        [weight.transpose(0, 2, 3, 1).reshape(C2, k * k * C1),
         bias.reshape(C2, 1)], axis=1)                              # (C2, F)

    # ---- minimal wrapper glue: free reshape + ONE small lane pad ----
    x_flat = x.reshape(N, C1, L)                                    # layout-preserving
    x_buf = jnp.pad(x_flat, ((0, 0), (0, 0), (D0, L_buf - D0 - L)))  # (N, C1, L_buf)

    kernel = functools.partial(_conv_silu_kernel, k=k, p=p, Wimg=W, N=N, D0=D0)

    out = pl.pallas_call(
        kernel,
        out_shape=jax.ShapeDtypeStruct((N, C2, L), jnp.float32),
        grid=(1,),                                   # whole batch in one step
        in_specs=[
            pl.BlockSpec((N, C1, L_buf), lambda i: (0, 0, 0)),   # images, resident
            pl.BlockSpec((F, N * L), lambda i: (0, 0)),          # padding masks
            pl.BlockSpec((C2, F), lambda i: (0, 0)),             # fused weights+bias
        ],
        out_specs=pl.BlockSpec((N, C2, L), lambda i: (0, 0, 0)),
        compiler_params=pltpu.CompilerParams(
            dimension_semantics=("arbitrary",)),
    )(x_buf, mask, w_cat)                                           # (N, C2, L)

    return out.reshape(N, C2, H, W)                                 # layout-preserving


def conv_reference(x, weight, bias, *, p=1, s=1):
    """Pure-JAX reference: conv2d + bias + SiLU (NCHW, full f32 precision)."""
    y = jax.lax.conv_general_dilated(
        x, weight, window_strides=(s, s), padding=[(p, p), (p, p)],
        dimension_numbers=("NCHW", "OIHW", "NCHW"),
        precision=jax.lax.Precision.HIGHEST)
    y = y + bias.reshape(1, -1, 1, 1)
    return y * jax.nn.sigmoid(y)


if __name__ == "__main__":
    key = jax.random.PRNGKey(0)
    kx, kw_key, kb = jax.random.split(key, 3)

    N, C1, H, W = 2, 4, 16, 16
    C2, k, p, s = 8, 3, 1, 1

    x = jax.random.normal(kx, (N, C1, H, W), dtype=jnp.float32)
    # deterministic synthetic parameters (Kaiming-ish scale), no checkpoint
    fan_in = C1 * k * k
    weight = jax.random.normal(kw_key, (C2, C1, k, k), dtype=jnp.float32) / jnp.sqrt(fan_in)
    bias = jax.random.normal(kb, (C2,), dtype=jnp.float32) * 0.1

    conv_jit = jax.jit(functools.partial(conv_forward, k=k, p=p, s=s))
    out = jax.block_until_ready(conv_jit(x, weight, bias))

    ref = jax.block_until_ready(conv_reference(x, weight, bias, p=p, s=s))
    assert out.shape == (N, C2, H, W)
    assert jnp.allclose(out, ref, atol=1e-4, rtol=1e-4), "mismatch vs reference"

    print("KERNEL_OK")
</pallas_src>

<mosaic_0001>
module attributes {stable_mosaic.version = 11 : i64} {
  func.func @_conv_silu_kernel(%arg0: i32, %arg1: memref<2x4x384xf32, #tpu.memory_space<vmem>>, %arg2: memref<37x512xf32, #tpu.memory_space<vmem>>, %arg3: memref<8x37xf32, #tpu.memory_space<vmem>>, %arg4: memref<2x8x256xf32, #tpu.memory_space<vmem>>) attributes {dimension_semantics = [#tpu.dimension_semantics<arbitrary>], iteration_bounds = array<i64: 1>, scalar_prefetch = 0 : i64, scratch_operands = 0 : i64, tpu.core_type = #tpu.core_type<tc>, window_params = [{pipeline_mode = #tpu.pipeline_mode<synchronous>, transform_indices = @transform_0, window_bounds = array<i64: 2, 4, 384>}, {pipeline_mode = #tpu.pipeline_mode<synchronous>, transform_indices = @transform_1, window_bounds = array<i64: 37, 512>}, {pipeline_mode = #tpu.pipeline_mode<synchronous>, transform_indices = @transform_2, window_bounds = array<i64: 8, 37>}, {pipeline_mode = #tpu.pipeline_mode<synchronous>, transform_indices = @transform_3, window_bounds = array<i64: 2, 8, 256>}]} {
    %c0 = arith.constant 0 : index
    %c0_0 = arith.constant 0 : index
    %c0_1 = arith.constant 0 : index
    %0 = vector.load %arg1[%c0, %c0_0, %c0_1] : memref<2x4x384xf32, #tpu.memory_space<vmem>>, vector<1x4x384xf32>
    %1 = vector.shape_cast %0 : vector<1x4x384xf32> to vector<4x384xf32>
    %2 = vector.extract_strided_slice %1 {offsets = [0, 0], sizes = [4, 256], strides = [1, 1]} : vector<4x384xf32> to vector<4x256xf32>
    %3 = vector.extract_strided_slice %1 {offsets = [0, 1], sizes = [4, 256], strides = [1, 1]} : vector<4x384xf32> to vector<4x256xf32>
    %4 = vector.extract_strided_slice %1 {offsets = [0, 2], sizes = [4, 256], strides = [1, 1]} : vector<4x384xf32> to vector<4x256xf32>
    %5 = vector.extract_strided_slice %1 {offsets = [0, 16], sizes = [4, 256], strides = [1, 1]} : vector<4x384xf32> to vector<4x256xf32>
    %6 = vector.extract_strided_slice %1 {offsets = [0, 17], sizes = [4, 256], strides = [1, 1]} : vector<4x384xf32> to vector<4x256xf32>
    %7 = vector.extract_strided_slice %1 {offsets = [0, 18], sizes = [4, 256], strides = [1, 1]} : vector<4x384xf32> to vector<4x256xf32>
    %8 = vector.extract_strided_slice %1 {offsets = [0, 32], sizes = [4, 256], strides = [1, 1]} : vector<4x384xf32> to vector<4x256xf32>
    %9 = vector.extract_strided_slice %1 {offsets = [0, 33], sizes = [4, 256], strides = [1, 1]} : vector<4x384xf32> to vector<4x256xf32>
    %10 = vector.extract_strided_slice %1 {offsets = [0, 34], sizes = [4, 256], strides = [1, 1]} : vector<4x384xf32> to vector<4x256xf32>
    %11 = tpu.concatenate %2, %3, %4, %5, %6, %7, %8, %9, %10 in 0 : vector<4x256xf32>, vector<4x256xf32>, vector<4x256xf32>, vector<4x256xf32>, vector<4x256xf32>, vector<4x256xf32>, vector<4x256xf32>, vector<4x256xf32>, vector<4x256xf32> -> vector<36x256xf32>
    %c1 = arith.constant 1 : index
    %c0_2 = arith.constant 0 : index
    %c0_3 = arith.constant 0 : index
    %12 = vector.load %arg1[%c1, %c0_2, %c0_3] : memref<2x4x384xf32, #tpu.memory_space<vmem>>, vector<1x4x384xf32>
    %13 = vector.shape_cast %12 : vector<1x4x384xf32> to vector<4x384xf32>
    %14 = vector.extract_strided_slice %13 {offsets = [0, 0], sizes = [4, 256], strides = [1, 1]} : vector<4x384xf32> to vector<4x256xf32>
    %15 = vector.extract_strided_slice %13 {offsets = [0, 1], sizes = [4, 256], strides = [1, 1]} : vector<4x384xf32> to vector<4x256xf32>
    %16 = vector.extract_strided_slice %13 {offsets = [0, 2], sizes = [4, 256], strides = [1, 1]} : vector<4x384xf32> to vector<4x256xf32>
    %17 = vector.extract_strided_slice %13 {offsets = [0, 16], sizes = [4, 256], strides = [1, 1]} : vector<4x384xf32> to vector<4x256xf32>
    %18 = vector.extract_strided_slice %13 {offsets = [0, 17], sizes = [4, 256], strides = [1, 1]} : vector<4x384xf32> to vector<4x256xf32>
    %19 = vector.extract_strided_slice %13 {offsets = [0, 18], sizes = [4, 256], strides = [1, 1]} : vector<4x384xf32> to vector<4x256xf32>
    %20 = vector.extract_strided_slice %13 {offsets = [0, 32], sizes = [4, 256], strides = [1, 1]} : vector<4x384xf32> to vector<4x256xf32>
    %21 = vector.extract_strided_slice %13 {offsets = [0, 33], sizes = [4, 256], strides = [1, 1]} : vector<4x384xf32> to vector<4x256xf32>
    %22 = vector.extract_strided_slice %13 {offsets = [0, 34], sizes = [4, 256], strides = [1, 1]} : vector<4x384xf32> to vector<4x256xf32>
    %23 = tpu.concatenate %14, %15, %16, %17, %18, %19, %20, %21, %22 in 0 : vector<4x256xf32>, vector<4x256xf32>, vector<4x256xf32>, vector<4x256xf32>, vector<4x256xf32>, vector<4x256xf32>, vector<4x256xf32>, vector<4x256xf32>, vector<4x256xf32> -> vector<36x256xf32>
    %24 = tpu.concatenate %11, %23 in 1 : vector<36x256xf32>, vector<36x256xf32> -> vector<36x512xf32>
    %cst = arith.constant 1.000000e+00 : f32
    %25 = vector.broadcast %cst : f32 to vector<1x512xf32>
    %26 = tpu.concatenate %24, %25 in 0 : vector<36x512xf32>, vector<1x512xf32> -> vector<37x512xf32>
    %c0_4 = arith.constant 0 : index
    %c0_5 = arith.constant 0 : index
    %27 = vector.load %arg2[%c0_4, %c0_5] : memref<37x512xf32, #tpu.memory_space<vmem>>, vector<37x512xf32>
    %28 = arith.mulf %26, %27 : vector<37x512xf32>
    %c0_6 = arith.constant 0 : index
    %c0_7 = arith.constant 0 : index
    %29 = vector.load %arg3[%c0_6, %c0_7] : memref<8x37xf32, #tpu.memory_space<vmem>>, vector<8x37xf32>
    %cst_8 = arith.constant dense<0.000000e+00> : vector<8x512xf32>
    %30 = tpu.matmul %29, %28, %cst_8 {dimension_numbers = #tpu.dot_dimension_numbers<[1], [0], [0], [1], [0, 0, 1, 1], [], []>} : vector<8x37xf32>, vector<37x512xf32>, vector<8x512xf32> -> vector<8x512xf32>
    %31 = arith.negf %30 : vector<8x512xf32>
    %32 = math.exp %31 : vector<8x512xf32>
    %cst_9 = arith.constant 1.000000e+00 : f32
    %33 = vector.broadcast %cst_9 : f32 to vector<8x512xf32>
    %34 = arith.addf %33, %32 : vector<8x512xf32>
    %35 = arith.divf %33, %34 : vector<8x512xf32>
    %36 = arith.mulf %30, %35 : vector<8x512xf32>
    %37 = vector.extract_strided_slice %36 {offsets = [0, 0], sizes = [8, 256], strides = [1, 1]} : vector<8x512xf32> to vector<8x256xf32>
    %c0_10 = arith.constant 0 : index
    %c0_11 = arith.constant 0 : index
    %c0_12 = arith.constant 0 : index
    %38 = vector.load %arg4[%c0_10, %c0_11, %c0_12] : memref<2x8x256xf32, #tpu.memory_space<vmem>>, vector<1x8x256xf32>
    %39 = vector.shape_cast %38 : vector<1x8x256xf32> to vector<8x256xf32>
    %40 = vector.shape_cast %37 : vector<8x256xf32> to vector<1x8x256xf32>
    tpu.vector_store %arg4[%c0_10, %c0_11, %c0_12], %40 {strides = array<i32>} : memref<2x8x256xf32, #tpu.memory_space<vmem>>, vector<1x8x256xf32>,
    %41 = vector.extract_strided_slice %36 {offsets = [0, 256], sizes = [8, 256], strides = [1, 1]} : vector<8x512xf32> to vector<8x256xf32>
    %c1_13 = arith.constant 1 : index
    %c0_14 = arith.constant 0 : index
    %c0_15 = arith.constant 0 : index
    %42 = vector.load %arg4[%c1_13, %c0_14, %c0_15] : memref<2x8x256xf32, #tpu.memory_space<vmem>>, vector<1x8x256xf32>
    %43 = vector.shape_cast %42 : vector<1x8x256xf32> to vector<8x256xf32>
    %44 = vector.shape_cast %41 : vector<8x256xf32> to vector<1x8x256xf32>
    tpu.vector_store %arg4[%c1_13, %c0_14, %c0_15], %44 {strides = array<i32>} : memref<2x8x256xf32, #tpu.memory_space<vmem>>, vector<1x8x256xf32>,
    return
  }
  func.func @transform_0(%arg0: i32) -> (i32, i32, i32) {
    %c0_i32 = arith.constant 0 : i32
    %c0_i32_0 = arith.constant 0 : i32
    %c0_i32_1 = arith.constant 0 : i32
    %c0_i32_2 = arith.constant 0 : i32
    return %c0_i32, %c0_i32_0, %c0_i32_1 : i32, i32, i32
  }
  func.func @transform_1(%arg0: i32) -> (i32, i32) {
    %c0_i32 = arith.constant 0 : i32
    %c0_i32_0 = arith.constant 0 : i32
    %c0_i32_1 = arith.constant 0 : i32
    return %c0_i32, %c0_i32_0 : i32, i32
  }
  func.func @transform_2(%arg0: i32) -> (i32, i32) {
    %c0_i32 = arith.constant 0 : i32
    %c0_i32_0 = arith.constant 0 : i32
    %c0_i32_1 = arith.constant 0 : i32
    return %c0_i32, %c0_i32_0 : i32, i32
  }
  func.func @transform_3(%arg0: i32) -> (i32, i32, i32) {
    %c0_i32 = arith.constant 0 : i32
    %c0_i32_0 = arith.constant 0 : i32
    %c0_i32_1 = arith.constant 0 : i32
    %c0_i32_2 = arith.constant 0 : i32
    return %c0_i32, %c0_i32_0, %c0_i32_1 : i32, i32, i32
  }
}

</mosaic_0001>

<bundles_post_ra>
// kernel: conv_forward.1
= control target key start
LH: loop header
LB: loop body
LE: loop exit
PB: predicated region body
PF: predicated region fallthrough
CT: control target
= control target key end

     0   :  { %s518_s16 = smov 126   ;;  %s519_s17 = smov 127   ;;  %v525_v10 = vmov 0.0   ;;  %vm28_vm0 = vcmask 1039360   ;;  %vm110_vm1 = vcmask 1043456   ;;  %vm39_vm2 = vcmask 1031168   ;;  %s742_s0 = inlined_call_operand.vmem [shape: f32[2,4,384], index: 0, kind: input, shape index: {}]   ;;  %s743_s1 = inlined_call_operand.vmem [shape: f32[37,512], index: 1, kind: input, shape index: {}]   ;;  %s744_s2 = inlined_call_operand.vmem [shape: f32[8,37], index: 2, kind: input, shape index: {}]   ;;  %s745_s3 = inlined_call_operand.vmem [shape: f32[2,8,256], index: 3, kind: output, shape index: {}]  }
   0x1   :  { %v550_v0 = vld [vmem:[%s742_s0 + $0x8] sm:$0xf]  ;;  %v555_v1 = vld [vmem:[%s742_s0] sm:$0xff]  ;;  %v458_v4 = vld [vmem:[%s742_s0 + $0x14] sm:$0xf]  ;;  %s520_s20 = smov 112   ;;  %342 = vmatprep.mubr.f32.mxu0 %v525_v10  ;;  %413 = vmatprep.mubr.f32.mxu1 %v525_v10 }
   0x2   :  { %37 = vrot.lane.b32.xlu1 %v550_v0, %s518_s16  ;;  %24 = vrot.lane.b32.xlu0 %v555_v1, %s519_s17  ;;  %v21_v2 = vcombine.low %v550_v0, %v550_v0  ;;  %v563_v3 = vcombine.high %v555_v1, %v555_v1  ;;  %v127_v5 = vcombine.low %v458_v4, %v458_v4  ;;  %v573_v6 = vld [vmem:[%s742_s0 + $0xc] sm:$0xff]  ;;  %s521_s0 = smov 111   ;;  %s522_s23 = smov 110   ;;  %vm50_vm3 = vcmask 916480   ;;  %v223_v35 = vld [vmem:[%s743_s1 + $0x18] sm:$0xff] }
   0x3   :  { %v578_v7 = vcombine.high %v573_v6, %v573_v6  ;;  %v20_v8 = vcombine.low %v555_v1, %v555_v1  ;;  %v126_v9 = vcombine.low %v573_v6, %v573_v6  ;;  %s523_s24 = smov 96   ;;  %s524_s25 = smov 95   ;;  %v221_v19 = vld [vmem:[%s743_s1 + $0x8] sm:$0xff]  ;;  %v227_v36 = vld [vmem:[%s743_s1 + $0x38] sm:$0xff]  ;;  %v220_v49 = vld [vmem:[%s743_s1] sm:$0xff]  ;;  %vm72_vm4 = vcmask 900096  }
   0x4   :  { %s526_s26 = smov 94   ;;  %v225_v20 = vld [vmem:[%s743_s1 + $0x28] sm:$0xff]  ;;  %v224_v50 = vld [vmem:[%s743_s1 + $0x20] sm:$0xff]  ;;  %v222_v60 = vld [vmem:[%s743_s1 + $0x10] sm:$0xff]  ;;  %vm61_vm5 = vcmask 908288   ;;  %vm83_vm6 = vcmask 785408  }
   0x5   :  { %v226_v61 = vld [vmem:[%s743_s1 + $0x30] sm:$0xff]  ;;  %vm94_vm7 = vcmask 777216   ;;  %vm105_vm8 = vcmask 769024   ;;  %vm265_vm9 = vcmask 1044480   ;;  %vm261_vm10 = vcmask 302080  }
   0x6   :  { %26 = vrot.lane.b32.xlu0 %v21_v2, %s519_s17  ;;  %35 = vrot.lane.b32.xlu1 %v563_v3, %s518_s16 }
   0xa   :  { %46 = vrot.lane.b32.xlu0 %v555_v1, %s520_s20  ;;  %48 = vrot.lane.b32.xlu1 %v21_v2, %s520_s20 }
   0xe   :  { %130 = vrot.lane.b32.xlu0 %v573_v6, %s519_s17  ;;  %132 = vrot.lane.b32.xlu1 %v127_v5, %s519_s17 }
  0x12   :  { %140 = vrot.lane.b32.xlu0 %v578_v7, %s518_s16  ;;  %142 = vrot.lane.b32.xlu1 %v458_v4, %s518_s16 }
  0x16   :  { %150 = vrot.lane.b32.xlu0 %v573_v6, %s520_s20  ;;  %152 = vrot.lane.b32.xlu1 %v127_v5, %s520_s20 }
  0x1a   :  { %22 = vrot.lane.b32.xlu0 %v20_v8, %s519_s17  ;;  %33 = vrot.lane.b32.xlu1 %v555_v1, %s518_s16 }
  0x1e   :  { %44 = vrot.lane.b32.xlu0 %v20_v8, %s520_s20  ;;  %128 = vrot.lane.b32.xlu1 %v126_v9, %s519_s17 }
  0x22   :  { %138 = vrot.lane.b32.xlu0 %v573_v6, %s518_s16  ;;  %148 = vrot.lane.b32.xlu1 %v126_v9, %s520_s20 }
  0x26   :  { %57 = vrot.lane.b32.xlu0 %v563_v3, %s521_s0  ;;  %59 = vrot.lane.b32.xlu1 %v550_v0, %s521_s0 }
  0x2a   :  { %68 = vrot.lane.b32.xlu0 %v555_v1, %s522_s23  ;;  %70 = vrot.lane.b32.xlu1 %v21_v2, %s522_s23 }
  0x2e   :  { %79 = vrot.lane.b32.xlu0 %v563_v3, %s523_s24  ;;  %81 = vrot.lane.b32.xlu1 %v550_v0, %s523_s24 }
  0x32   :  { %90 = vrot.lane.b32.xlu0 %v555_v1, %s524_s25  ;;  %92 = vrot.lane.b32.xlu1 %v21_v2, %s524_s25 }
  0x36   :  { %160 = vrot.lane.b32.xlu0 %v578_v7, %s521_s0  ;;  %162 = vrot.lane.b32.xlu1 %v458_v4, %s521_s0 }
  0x3a   :  { %170 = vrot.lane.b32.xlu0 %v573_v6, %s522_s23  ;;  %172 = vrot.lane.b32.xlu1 %v127_v5, %s522_s23 }
  0x3e   :  { %180 = vrot.lane.b32.xlu0 %v578_v7, %s523_s24  ;;  %182 = vrot.lane.b32.xlu1 %v458_v4, %s523_s24 }
  0x42   :  { %190 = vrot.lane.b32.xlu0 %v573_v6, %s524_s25  ;;  %192 = vrot.lane.b32.xlu1 %v127_v5, %s524_s25 }
  0x46   :  { %55 = vrot.lane.b32.xlu0 %v555_v1, %s521_s0  ;;  %66 = vrot.lane.b32.xlu1 %v20_v8, %s522_s23 }
  0x4a   :  { %77 = vrot.lane.b32.xlu0 %v555_v1, %s523_s24  ;;  %88 = vrot.lane.b32.xlu1 %v20_v8, %s524_s25 }
  0x4e   :  { %158 = vrot.lane.b32.xlu0 %v573_v6, %s521_s0  ;;  %168 = vrot.lane.b32.xlu1 %v126_v9, %s522_s23 }
  0x52   :  { %178 = vrot.lane.b32.xlu0 %v573_v6, %s523_s24  ;;  %188 = vrot.lane.b32.xlu1 %v126_v9, %s524_s25 }
  0x56   :  { %101 = vrot.lane.b32.xlu0 %v563_v3, %s526_s26  ;;  %103 = vrot.lane.b32.xlu1 %v550_v0, %s526_s26 }
  0x5a   :  { %200 = vrot.lane.b32.xlu0 %v578_v7, %s526_s26  ;;  %202 = vrot.lane.b32.xlu1 %v458_v4, %s526_s26 }
  0x5e   :  { %99 = vrot.lane.b32.xlu0 %v555_v1, %s526_s26  ;;  %198 = vrot.lane.b32.xlu1 %v573_v6, %s526_s26 }
  0x74   :  { %v38_v11 = vpop.permute.xlu1 %37  ;;  %v25_v12 = vpop.permute.xlu0 %24 }
  0x78   :  { %v27_v13 = vpop.permute.xlu0 %26  ;;  %v36_v14 = vpop.permute.xlu1 %35 }
  0x79   :  { %v30_v15 = vsel %vm28_vm0, %v25_v12, %v27_v13  ;;  %v41_v21 = vsel %vm39_vm2, %v36_v14, %v38_v11  ;;  %v229_v13 = vld [vmem:[%s743_s1 + $0x48] sm:$0xff] }
  0x7a   :  { %v112_v18 = vsel %vm110_vm1, %v563_v3, %v30_v15 }
  0x7b   :  { %v241_v24 = vmul.f32 %v221_v19, %v112_v18 }
  0x7c   :  { %v47_v16 = vpop.permute.xlu0 %46  ;;  %v49_v17 = vpop.permute.xlu1 %48 }
  0x7d   :  { %v52_v22 = vsel %vm50_vm3, %v47_v16, %v49_v17 }
  0x7e   :  { %v114_v23 = vsel %vm110_vm1, %v41_v21, %v52_v22 }
  0x7f   :  { %v245_v25 = vmul.f32 %v225_v20, %v114_v23 }
  0x80   :  { %v131_v26 = vpop.permute.xlu0 %130  ;;  %v133_v27 = vpop.permute.xlu1 %132 }
  0x81   :  { %v471_v28 = vpack.c.bf16 %v245_v25, %v241_v24  ;;  %v135_v31 = vsel %vm28_vm0, %v131_v26, %v133_v27 }
  0x82   :  { %v209_v34 = vsel %vm110_vm1, %v578_v7, %v135_v31 }
  0x83   :  { %472 = vmatprep.subr.bf16.mxu0 %v471_v28  ;;  %v243_v40 = vmul.f32 %v223_v35, %v209_v34  ;;  %v235_v35 = vld [vmem:[%s743_s1 + $0x78] sm:$0xff] }
  0x84   :  { %v141_v29 = vpop.permute.xlu0 %140  ;;  %v143_v30 = vpop.permute.xlu1 %142 }
  0x85   :  { %v145_v37 = vsel %vm39_vm2, %v141_v29, %v143_v30 }
  0x88   :  { %v151_v32 = vpop.permute.xlu0 %150  ;;  %v153_v33 = vpop.permute.xlu1 %152 }
  0x89   :  { %v155_v38 = vsel %vm50_vm3, %v151_v32, %v153_v33 }
  0x8a   :  { %v211_v39 = vsel %vm110_vm1, %v145_v37, %v155_v38 }
  0x8b   :  { %v247_v41 = vmul.f32 %v227_v36, %v211_v39 }
  0x8c   :  { %v23_v42 = vpop.permute.xlu0 %22  ;;  %v34_v43 = vpop.permute.xlu1 %33 }
  0x8d   :  { %v29_v44 = vsel %vm28_vm0, %v23_v42, %v25_v12  ;;  %v479_v45 = vpack.c.bf16 %v247_v41, %v243_v40  ;;  %v40_v51 = vsel %vm39_vm2, %v34_v43, %v36_v14 }
  0x8e   :  { %v111_v46 = vsel %vm110_vm1, %v555_v1, %v29_v44 }
  0x8f   :  { %480 = vmatprep.subr.bf16.mxu1 %v479_v45  ;;  %v240_v55 = vmul.f32 %v220_v49, %v111_v46 }
  0x90   :  { %v45_v47 = vpop.permute.xlu0 %44  ;;  %v129_v48 = vpop.permute.xlu1 %128 }
  0x91   :  { %v51_v52 = vsel %vm50_vm3, %v45_v47, %v47_v16  ;;  %v134_v53 = vsel %vm28_vm0, %v129_v48, %v131_v26  ;;  %v233_v16 = vld [vmem:[%s743_s1 + $0x68] sm:$0xff]  ;;  %v228_v47 = vld [vmem:[%s743_s1 + $0x40] sm:$0xff] }
  0x92   :  { %v113_v54 = vsel %vm110_vm1, %v40_v51, %v51_v52  ;;  %v208_v57 = vsel %vm110_vm1, %v573_v6, %v134_v53 }
  0x93   :  { %v244_v56 = vmul.f32 %v224_v50, %v113_v54  ;;  %v242_v2 = vmul.f32 %v222_v60, %v208_v57  ;;  %v232_v50 = vld [vmem:[%s743_s1 + $0x60] sm:$0xff] }
  0x94   :  { %v139_v58 = vpop.permute.xlu0 %138  ;;  %v149_v59 = vpop.permute.xlu1 %148 }
  0x95   :  { %v144_v62 = vsel %vm39_vm2, %v139_v58, %v141_v29  ;;  %v154_v63 = vsel %vm50_vm3, %v149_v59, %v151_v32  ;;  %v473_v0 = vpack.c.bf16 %v244_v56, %v240_v55  ;;  %v231_v32 = vld [vmem:[%s743_s1 + $0x58] sm:$0xff] }
  0x96   :  { %v210_v1 = vsel %vm110_vm1, %v144_v62, %v154_v63  ;;  %v230_v62 = vld [vmem:[%s743_s1 + $0x50] sm:$0xff] }
  0x97   :  { %474 = vmatpush1.bf16.msra.mxu0 %v473_v0  ;;  %v246_v3 = vmul.f32 %v226_v61, %v210_v1  ;;  %v234_v1 = vld [vmem:[%s743_s1 + $0x70] sm:$0xff] }
  0x98   :  { %v58_v4 = vpop.permute.xlu0 %57  ;;  %v60_v5 = vpop.permute.xlu1 %59 }
  0x99   :  { %v481_v6 = vpack.c.bf16 %v246_v3, %v242_v2  ;;  %v63_v12 = vsel %vm61_vm5, %v58_v4, %v60_v5 }
  0x9b   :  { %482 = vmatpush1.bf16.msra.mxu1 %v481_v6 }
  0x9c   :  { %v69_v7 = vpop.permute.xlu0 %68  ;;  %v71_v8 = vpop.permute.xlu1 %70 }
  0x9d   :  { %v74_v11 = vsel %vm72_vm4, %v69_v7, %v71_v8 }
  0x9e   :  { %v116_v14 = vsel %vm110_vm1, %v63_v12, %v74_v11 }
  0x9f   :  { %v249_v21 = vmul.f32 %v229_v13, %v116_v14 }
  0xa0   :  { %v80_v9 = vpop.permute.xlu0 %79  ;;  %v82_v10 = vpop.permute.xlu1 %81 }
  0xa1   :  { %v85_v18 = vsel %vm83_vm6, %v80_v9, %v82_v10 }
  0xa4   :  { %v91_v15 = vpop.permute.xlu0 %90  ;;  %v93_v17 = vpop.permute.xlu1 %92 }
  0xa5   :  { %v96_v19 = vsel %vm94_vm7, %v91_v15, %v93_v17 }
  0xa6   :  { %v118_v20 = vsel %vm110_vm1, %v85_v18, %v96_v19 }
  0xa7   :  { %v253_v22 = vmul.f32 %v233_v16, %v118_v20  ;;  %v239_v16 = vld [vmem:[%s743_s1 + $0x98] sm:$0x1f] }
  0xa8   :  { %v161_v23 = vpop.permute.xlu0 %160  ;;  %v163_v24 = vpop.permute.xlu1 %162 }
  0xa9   :  { %v475_v25 = vpack.c.bf16 %v253_v22, %v249_v21  ;;  %v165_v31 = vsel %vm61_vm5, %v161_v23, %v163_v24  ;;  %v236_v21 = vld [vmem:[%s743_s1 + $0x80] sm:$0x1f] }
  0xab   :  { %476 = vmatprep.subr.bf16.mxu0 %v475_v25 }
  0xac   :  { %v171_v26 = vpop.permute.xlu0 %170  ;;  %v173_v27 = vpop.permute.xlu1 %172 }
  0xad   :  { %v175_v30 = vsel %vm72_vm4, %v171_v26, %v173_v27 }
  0xae   :  { %v213_v33 = vsel %vm110_vm1, %v165_v31, %v175_v30  ;;  %v260_v31 = vld [vmem:[%s744_s2] sm:$0xff] }
  0xaf   :  { %v251_v40 = vmul.f32 %v231_v32, %v213_v33 }
  0xb0   :  { %v181_v28 = vpop.permute.xlu0 %180  ;;  %v183_v29 = vpop.permute.xlu1 %182 }
  0xb1   :  { %v185_v37 = vsel %vm83_vm6, %v181_v28, %v183_v29 }
  0xb4   :  { %v191_v34 = vpop.permute.xlu0 %190  ;;  %v193_v36 = vpop.permute.xlu1 %192 }
  0xb5   :  { %v195_v38 = vsel %vm94_vm7, %v191_v34, %v193_v36 }
  0xb6   :  { %v215_v39 = vsel %vm110_vm1, %v185_v37, %v195_v38 }
  0xb7   :  { %v255_v41 = vmul.f32 %v235_v35, %v215_v39 }
  0xb8   :  { %v56_v42 = vpop.permute.xlu0 %55  ;;  %v67_v43 = vpop.permute.xlu1 %66 }
  0xb9   :  { %v62_v44 = vsel %vm61_vm5, %v56_v42, %v58_v4  ;;  %v73_v45 = vsel %vm72_vm4, %v67_v43, %v69_v7  ;;  %v483_v46 = vpack.c.bf16 %v255_v41, %v251_v40 }
  0xba   :  { %v115_v48 = vsel %vm110_vm1, %v62_v44, %v73_v45 }
  0xbb   :  { %484 = vmatprep.subr.bf16.mxu1 %v483_v46  ;;  %v248_v55 = vmul.f32 %v228_v47, %v115_v48 }
  0xbc   :  { %v78_v49 = vpop.permute.xlu0 %77  ;;  %v89_v51 = vpop.permute.xlu1 %88 }
  0xbd   :  { %v84_v52 = vsel %vm83_vm6, %v78_v49, %v80_v9  ;;  %v95_v53 = vsel %vm94_vm7, %v89_v51, %v91_v15  ;;  %v237_v9 = vld [vmem:[%s743_s1 + $0x88] sm:$0x1f] }
  0xbe   :  { %v117_v54 = vsel %vm110_vm1, %v84_v52, %v95_v53 }
  0xbf   :  { %v252_v56 = vmul.f32 %v232_v50, %v117_v54 }
  0xc0   :  { %v159_v57 = vpop.permute.xlu0 %158  ;;  %v169_v58 = vpop.permute.xlu1 %168 }
  0xc1   :  { %v164_v59 = vsel %vm61_vm5, %v159_v57, %v161_v23  ;;  %v174_v60 = vsel %vm72_vm4, %v169_v58, %v171_v26  ;;  %v477_v61 = vpack.c.bf16 %v252_v56, %v248_v55  ;;  %v238_v23 = vld [vmem:[%s743_s1 + $0x90] sm:$0x1f] }
  0xc2   :  { %v212_v63 = vsel %vm110_vm1, %v164_v59, %v174_v60 }
  0xc3   :  { %478 = vmatpush1.bf16.msra.mxu0 %v477_v61  ;;  %v250_v6 = vmul.f32 %v230_v62, %v212_v63 }
  0xc4   :  { %v179_v0 = vpop.permute.xlu0 %178  ;;  %v189_v2 = vpop.permute.xlu1 %188 }
  0xc5   :  { %v184_v3 = vsel %vm83_vm6, %v179_v0, %v181_v28  ;;  %v194_v4 = vsel %vm94_vm7, %v189_v2, %v191_v34 }
  0xc6   :  { %v214_v5 = vsel %vm110_vm1, %v184_v3, %v194_v4 }
  0xc7   :  { %v254_v7 = vmul.f32 %v234_v1, %v214_v5 }
  0xc8   :  { %v102_v8 = vpop.permute.xlu0 %101  ;;  %v104_v10 = vpop.permute.xlu1 %103 }
  0xc9   :  { %v107_v11 = vsel %vm105_vm8, %v102_v8, %v104_v10  ;;  %v485_v12 = vpack.c.bf16 %v254_v7, %v250_v6 }
  0xca   :  { %v217_v13 = vsel %vm110_vm1, %v107_v11, 1.0 }
  0xcb   :  { %v257_v14 = vmul.f32 %v237_v9, %v217_v13  ;;  %486 = vmatpush1.bf16.msra.mxu1 %v485_v12 }
  0xcc   :  { %v201_v15 = vpop.permute.xlu0 %200  ;;  %v203_v17 = vpop.permute.xlu1 %202 }
  0xcd   :  { %v205_v18 = vsel %vm105_vm8, %v201_v15, %v203_v17  ;;  %459 = vmatprep.subr.msk.mxu0 %vm265_vm9, %v257_v14 }
  0xce   :  { %v219_v19 = vsel %vm110_vm1, %v205_v18, 1.0 }
  0xcf   :  { %v259_v20 = vmul.f32 %v239_v16, %v219_v19 }
  0xd0   :  { %v100_v22 = vpop.permute.xlu0 %99  ;;  %v199_v24 = vpop.permute.xlu1 %198 }
  0xd1   :  { %v106_v25 = vsel %vm105_vm8, %v100_v22, %v102_v8  ;;  %v204_v26 = vsel %vm105_vm8, %v199_v24, %v201_v15  ;;  %462 = vmatprep.subr.msk.mxu1 %vm265_vm9, %v259_v20 }
  0xd2   :  { %v216_v27 = vsel %vm110_vm1, %v106_v25, 1.0  ;;  %v218_v28 = vsel %vm110_vm1, %v204_v26, 1.0 }
  0xd3   :  { %v256_v29 = vmul.f32 %v236_v21, %v216_v27  ;;  %v258_v30 = vmul.f32 %v238_v23, %v218_v28 }
  0xd5   :  { %460 = vmatpush1.msk.msra.mxu0 %vm265_vm9, %v256_v29  ;;  %463 = vmatpush1.msk.msra.mxu1 %vm265_vm9, %v258_v30 }
  0xd6   :  { %461 = vmatmul.mubr.msk.f32.vlgmr.msra.gmra.mrb[0].mxu0 %vm261_vm10, %v260_v31  ;;  %464 = vmatmul.mubr.msk.f32.vlgmr.msra.gmra.mrb[0].mxu1 %vm261_vm10, %v260_v31 }
 0x1a9   :  { %v344_v32 = vpop.f32.mrb[0].mxu0  ;;  %v415_v33 = vpop.f32.mrb[0].mxu1 }
 0x1aa   :  { %v465_v34 = vmul.f32 -1.442695, %v344_v32  ;;  %v467_v35 = vmul.f32 -1.442695, %v415_v33  ;;  %v346_v36 = vpop.f32.mrb[1].mxu0  ;;  %v417_v37 = vpop.f32.mrb[1].mxu1 }
 0x1ab   :  { %v466_v38 = vmul.f32 -1.442695, %v346_v36  ;;  %v468_v39 = vmul.f32 -1.442695, %v417_v37 }
 0x1ac   :  { %502 = vpow2.f32 %v465_v34 }
 0x1ad   :  { %504 = vpow2.f32 %v467_v35 }
 0x1ae   :  { %506 = vpow2.f32 %v466_v38 }
 0x1af   :  { %508 = vpow2.f32 %v468_v39 }
 0x1b6   :  { %v503_v40 = vpop.eup %502 }
 0x1b7   :  { %v505_v41 = vpop.eup %504  ;;  %v432_v42 = vadd.f32 1.0, %v503_v40 }
 0x1b8   :  { %v507_v43 = vpop.eup %506  ;;  %v434_v44 = vadd.f32 1.0, %v505_v41 }
 0x1b9   :  { %v509_v45 = vpop.eup %508  ;;  %510 = vrcp.f32 %v432_v42  ;;  %v433_v46 = vadd.f32 1.0, %v507_v43 }
 0x1ba   :  { %512 = vrcp.f32 %v434_v44  ;;  %v435_v47 = vadd.f32 1.0, %v509_v45 }
 0x1bb   :  { %514 = vrcp.f32 %v433_v46 }
 0x1bc   :  { %516 = vrcp.f32 %v435_v47 }
 0x1c3   :  { %v511_v48 = vpop.eup %510 }
 0x1c4   :  { %v513_v49 = vpop.eup %512  ;;  %v444_v50 = vmul.f32 %v511_v48, %v344_v32 }
 0x1c5   :  { %v515_v51 = vpop.eup %514  ;;  %v446_v52 = vmul.f32 %v513_v49, %v415_v33 }
 0x1c6   :  { %v517_v53 = vpop.eup %516  ;;  %448 = vst [vmem:[%s745_s3] sm:$0xff] %v444_v50  ;;  %v445_v54 = vmul.f32 %v515_v51, %v346_v36 }
 0x1c7   :  { %469 = vst [vmem:[%s745_s3 + $0x10] sm:$0xff] %v446_v52  ;;  %v447_v55 = vmul.f32 %v517_v53, %v417_v37 }
 0x1c8   :  { %449 = vst [vmem:[%s745_s3 + $0x8] sm:$0xff] %v445_v54 }
 0x1c9   :  { %470 = vst [vmem:[%s745_s3 + $0x18] sm:$0xff] %v447_v55 }

</bundles_post_ra>
